<compile_context>
chip_gen: v7x
topology: tpu7x:2x2x1
jax: 0.10.0
libtpu: 0.0.40
codegen_flags: <defaults>
</compile_context>

<pallas_src>
import functools

import jax
import jax.numpy as jnp
from jax import lax
from jax.experimental import pallas as pl
from jax.experimental.pallas import tpu as pltpu


def _ntxent_kernel(r1_ref, r2_ref, c1_ref, c2_ref, o_ref,
                   m1_ref, l1_ref, m2_ref, l2_ref, *, inv_temp):
    i = pl.program_id(0)                  # row-tile index     (parallel)
    j = pl.program_id(1)                  # column-tile index  (reduction, last)
    nj = pl.num_programs(1)

    tm = r1_ref.shape[0]
    tn = c1_ref.shape[0]

    @pl.when(j == 0)
    def _init():
        m1_ref[...] = jnp.full(m1_ref.shape, -jnp.inf, jnp.float32)
        m2_ref[...] = jnp.full(m2_ref.shape, -jnp.inf, jnp.float32)
        l1_ref[...] = jnp.zeros(l1_ref.shape, jnp.float32)
        l2_ref[...] = jnp.zeros(l2_ref.shape, jnp.float32)

    # bf16 operands straight into the MXU, f32 accumulation.  No pre-scaling:
    # 1/temperature is folded into the exp argument / finalize in f32.
    dims = (((1,), (1,)), ((), ()))        # contract last dim of both operands
    s11 = lax.dot_general(r1_ref[...], c1_ref[...], dims,
                          preferred_element_type=jnp.float32)
    s12 = lax.dot_general(r1_ref[...], c2_ref[...], dims,
                          preferred_element_type=jnp.float32)
    s21 = lax.dot_general(r2_ref[...], c1_ref[...], dims,
                          preferred_element_type=jnp.float32)
    s22 = lax.dot_general(r2_ref[...], c2_ref[...], dims,
                          preferred_element_type=jnp.float32)

    # Exclude the self-similarity (diagonal of the full 2Bx2B matrix).  It can
    # only appear in the view1/view1 and view2/view2 tiles, where the global
    # row index equals the global column index.  Tile-local iota + one scalar
    # offset; masked entries become exp(-inf) = 0 downstream (no NaN paths).
    # TODO(synk): gate this behind a rows-overlap-columns lax.cond once vector
    # -valued scf.if lowering is confirmed on all target generations.
    rr = lax.broadcasted_iota(jnp.int32, (tm, tn), 0) + (i * tm - j * tn)
    cc = lax.broadcasted_iota(jnp.int32, (tm, tn), 1)
    self_mask = rr == cc
    neg_inf = jnp.float32(-jnp.inf)
    s11 = jnp.where(self_mask, neg_inf, s11)
    s22 = jnp.where(self_mask, neg_inf, s22)

    # Online logsumexp (flash-softmax style), one fused reduce pair per view.
    # m is kept in RAW similarity units; 1/T is applied inside the exp.
    m1_prev = m1_ref[...]
    m2_prev = m2_ref[...]
    m1_new = jnp.maximum(
        m1_prev, jnp.max(jnp.maximum(s11, s12), axis=-1, keepdims=True))
    m2_new = jnp.maximum(
        m2_prev, jnp.max(jnp.maximum(s21, s22), axis=-1, keepdims=True))

    e1 = (jnp.exp((s11 - m1_new) * inv_temp)
          + jnp.exp((s12 - m1_new) * inv_temp))
    e2 = (jnp.exp((s22 - m2_new) * inv_temp)
          + jnp.exp((s21 - m2_new) * inv_temp))

    l1_ref[...] = (jnp.exp((m1_prev - m1_new) * inv_temp) * l1_ref[...]
                   + jnp.sum(e1, axis=-1, keepdims=True))
    l2_ref[...] = (jnp.exp((m2_prev - m2_new) * inv_temp) * l2_ref[...]
                   + jnp.sum(e2, axis=-1, keepdims=True))
    m1_ref[...] = m1_new
    m2_ref[...] = m2_new

    @pl.when(j == nj - 1)
    def _finalize():
        # Single positive per row: sim(p1[i], p2[i]) / T, computed once per
        # row tile from the resident (VMEM) row blocks, upcast to f32.
        r1f = r1_ref[...].astype(jnp.float32)
        r2f = r2_ref[...].astype(jnp.float32)
        pos = jnp.sum(r1f * r2f, axis=-1, keepdims=True) * inv_temp   # (TM, 1)
        loss1 = m1_ref[...] * inv_temp + jnp.log(l1_ref[...]) - pos   # view-1
        loss2 = m2_ref[...] * inv_temp + jnp.log(l2_ref[...]) - pos   # view-2
        o_ref[0] = loss1
        o_ref[1] = loss2


def _pick_tile(n, cap):
    """Largest multiple-of-8 divisor of n that is <= cap (full extent if n<=cap)."""
    if n <= cap or n % 8 != 0:
        # Full-extent blocks are always legal.
        # TODO(synk): pad-and-mask instead for huge batches not divisible by 8.
        return n
    best = 8
    t = 8
    while t <= cap:
        if n % t == 0:
            best = t
        t += 8
    return best


def ntxent_loss(projections_1: jax.Array,
                projections_2: jax.Array,
                temperature: float = 0.1) -> jax.Array:
    """NT-Xent loss matching the PyTorch module. Inputs (B, D); returns scalar."""
    assert projections_1.shape == projections_2.shape
    assert projections_1.ndim == 2
    # bf16 in HBM halves the re-streamed column traffic and feeds the MXU at
    # full bf16 rate; all exp/log/accumulation math stays in f32 in-kernel.
    p1 = projections_1.astype(jnp.bfloat16)
    p2 = projections_2.astype(jnp.bfloat16)
    b, d = p1.shape

    # Row tile: bigger TM -> fewer full passes over the column embeddings.
    tm = _pick_tile(b, 256)
    if tm == b and b >= 256 and (b // 2) % 8 == 0:
        tm = b // 2          # keep >=2 row tiles so both v7x TensorCores work
    # Column tile: fat tiles amortize per-grid-step overhead; derate by D so
    # double-buffered bf16 column blocks stay ~<=2 MiB per view per buffer.
    tn_cap = int(min(1024, max(128, (1 << 20) // max(d, 1))))
    tn = _pick_tile(b, tn_cap)
    grid = (b // tm, b // tn)

    bytes_accessed = ((b // tm) * 2 * b * d * 2    # column tiles, re-streamed
                      + 2 * b * d * 2              # row tiles, one pass
                      + 2 * b * 4)                 # per-row losses out
    cost = pl.CostEstimate(flops=8 * b * b * d,
                           transcendentals=4 * b * b,
                           bytes_accessed=bytes_accessed)

    kernel = functools.partial(_ntxent_kernel, inv_temp=1.0 / float(temperature))
    per_row_loss = pl.pallas_call(
        kernel,
        out_shape=jax.ShapeDtypeStruct((2, b, 1), jnp.float32),
        grid_spec=pltpu.PrefetchScalarGridSpec(
            num_scalar_prefetch=0,
            grid=grid,
            in_specs=[
                pl.BlockSpec((tm, d), lambda i, j: (i, 0)),   # view-1 row tile
                pl.BlockSpec((tm, d), lambda i, j: (i, 0)),   # view-2 row tile
                pl.BlockSpec((tn, d), lambda i, j: (j, 0)),   # view-1 col tile
                pl.BlockSpec((tn, d), lambda i, j: (j, 0)),   # view-2 col tile
            ],
            out_specs=pl.BlockSpec((2, tm, 1), lambda i, j: (0, i, 0)),
            scratch_shapes=[
                pltpu.VMEM((tm, 1), jnp.float32),   # running max, view-1 rows
                pltpu.VMEM((tm, 1), jnp.float32),   # running sum, view-1 rows
                pltpu.VMEM((tm, 1), jnp.float32),   # running max, view-2 rows
                pltpu.VMEM((tm, 1), jnp.float32),   # running sum, view-2 rows
            ],
        ),
        compiler_params=pltpu.CompilerParams(
            dimension_semantics=("parallel", "arbitrary"),
            vmem_limit_bytes=48 * 1024 * 1024),
        cost_estimate=cost,
    )(p1, p2, p1, p2)

    # Final mean over the 2B per-row losses (tiny reduction, plain JAX).
    return jnp.mean(per_row_loss)


def _ntxent_loss_ref(p1, p2, temperature=0.1):
    """Pure-JAX mirror of the PyTorch NTXentLoss.forward (un-stabilized)."""
    b = p1.shape[0]
    n = 2 * b
    p = jnp.concatenate([p1, p2], axis=0)
    sim = jnp.matmul(p, p.T, precision=lax.Precision.HIGHEST) / temperature
    labels = jnp.concatenate([jnp.arange(b), jnp.arange(b)])
    labels = (labels[None, :] == labels[:, None]).astype(jnp.float32) - jnp.eye(n)
    exp_sim = jnp.exp(sim) * (1.0 - jnp.eye(n))
    pos = (exp_sim * labels).sum(axis=1)
    neg = exp_sim.sum(axis=1)
    return jnp.mean(-jnp.log(pos / neg))


if __name__ == "__main__":
    key = jax.random.PRNGKey(0)
    k1, k2 = jax.random.split(key)
    B, D = 8, 32
    proj1 = jax.random.normal(k1, (B, D), dtype=jnp.float32)
    proj2 = jax.random.normal(k2, (B, D), dtype=jnp.float32)
    # L2-normalize as SimCLR does upstream of this loss; the un-stabilized
    # PyTorch formulation (and the reference above) overflow exp() for raw
    # Gaussian inputs at temperature=0.1.  The kernel itself is logsumexp-
    # stable either way.
    proj1 = proj1 / jnp.linalg.norm(proj1, axis=-1, keepdims=True)
    proj2 = proj2 / jnp.linalg.norm(proj2, axis=-1, keepdims=True)

    loss = jax.block_until_ready(ntxent_loss(proj1, proj2, temperature=0.1))

    # Reference evaluated on the same bf16-rounded operands the kernel sees
    # (the remaining difference is only f32 accumulation order).
    q1 = proj1.astype(jnp.bfloat16).astype(jnp.float32)
    q2 = proj2.astype(jnp.bfloat16).astype(jnp.float32)
    ref = _ntxent_loss_ref(q1, q2, temperature=0.1)

    assert jnp.isfinite(loss), loss
    assert jnp.allclose(loss, ref, rtol=2e-3, atol=2e-3), (loss, ref)
    print("KERNEL_OK")
</pallas_src>

<mosaic_0001>
module attributes {stable_mosaic.version = 11 : i64} {
  func.func @_ntxent_kernel(%arg0: i32, %arg1: i32, %arg2: memref<8x32xbf16, #tpu.memory_space<vmem>>, %arg3: memref<8x32xbf16, #tpu.memory_space<vmem>>, %arg4: memref<8x32xbf16, #tpu.memory_space<vmem>>, %arg5: memref<8x32xbf16, #tpu.memory_space<vmem>>, %arg6: memref<2x8x1xf32, #tpu.memory_space<vmem>>, %arg7: memref<8x1xf32, #tpu.memory_space<vmem>>, %arg8: memref<8x1xf32, #tpu.memory_space<vmem>>, %arg9: memref<8x1xf32, #tpu.memory_space<vmem>>, %arg10: memref<8x1xf32, #tpu.memory_space<vmem>>) attributes {dimension_semantics = [#tpu.dimension_semantics<parallel>, #tpu.dimension_semantics<arbitrary>], iteration_bounds = array<i64: 1, 1>, scalar_prefetch = 0 : i64, scratch_operands = 4 : i64, tpu.core_type = #tpu.core_type<tc>, window_params = [{transform_indices = @transform_0, window_bounds = array<i64: 8, 32>}, {transform_indices = @transform_1, window_bounds = array<i64: 8, 32>}, {transform_indices = @transform_2, window_bounds = array<i64: 8, 32>}, {transform_indices = @transform_3, window_bounds = array<i64: 8, 32>}, {transform_indices = @transform_4, window_bounds = array<i64: 2, 8, 1>}]} {
    %c0_i32 = arith.constant 0 : i32
    %0 = arith.cmpi eq, %arg1, %c0_i32 : i32
    %1 = arith.extui %0 : i1 to i32
    %c0_i32_0 = arith.constant 0 : i32
    %2 = arith.cmpi ne, %1, %c0_i32_0 : i32
    scf.if %2 {
      %cst_50 = arith.constant 0xFF800000 : f32
      %84 = vector.broadcast %cst_50 : f32 to vector<8x1xf32>
      %c0_51 = arith.constant 0 : index
      %c0_52 = arith.constant 0 : index
      %85 = vector.load %arg7[%c0_51, %c0_52] : memref<8x1xf32, #tpu.memory_space<vmem>>, vector<8x1xf32>
      tpu.vector_store %arg7[%c0_51, %c0_52], %84 {strides = array<i32>} : memref<8x1xf32, #tpu.memory_space<vmem>>, vector<8x1xf32>,
      %cst_53 = arith.constant 0xFF800000 : f32
      %86 = vector.broadcast %cst_53 : f32 to vector<8x1xf32>
      %c0_54 = arith.constant 0 : index
      %c0_55 = arith.constant 0 : index
      %87 = vector.load %arg9[%c0_54, %c0_55] : memref<8x1xf32, #tpu.memory_space<vmem>>, vector<8x1xf32>
      tpu.vector_store %arg9[%c0_54, %c0_55], %86 {strides = array<i32>} : memref<8x1xf32, #tpu.memory_space<vmem>>, vector<8x1xf32>,
      %cst_56 = arith.constant 0.000000e+00 : f32
      %88 = vector.broadcast %cst_56 : f32 to vector<8x1xf32>
      %c0_57 = arith.constant 0 : index
      %c0_58 = arith.constant 0 : index
      %89 = vector.load %arg8[%c0_57, %c0_58] : memref<8x1xf32, #tpu.memory_space<vmem>>, vector<8x1xf32>
      tpu.vector_store %arg8[%c0_57, %c0_58], %88 {strides = array<i32>} : memref<8x1xf32, #tpu.memory_space<vmem>>, vector<8x1xf32>,
      %cst_59 = arith.constant 0.000000e+00 : f32
      %90 = vector.broadcast %cst_59 : f32 to vector<8x1xf32>
      %c0_60 = arith.constant 0 : index
      %c0_61 = arith.constant 0 : index
      %91 = vector.load %arg10[%c0_60, %c0_61] : memref<8x1xf32, #tpu.memory_space<vmem>>, vector<8x1xf32>
      tpu.vector_store %arg10[%c0_60, %c0_61], %90 {strides = array<i32>} : memref<8x1xf32, #tpu.memory_space<vmem>>, vector<8x1xf32>,
    } else {
    }
    %c0 = arith.constant 0 : index
    %c0_1 = arith.constant 0 : index
    %3 = vector.load %arg2[%c0, %c0_1] : memref<8x32xbf16, #tpu.memory_space<vmem>>, vector<8x32xbf16>
    %c0_2 = arith.constant 0 : index
    %c0_3 = arith.constant 0 : index
    %4 = vector.load %arg4[%c0_2, %c0_3] : memref<8x32xbf16, #tpu.memory_space<vmem>>, vector<8x32xbf16>
    %cst = arith.constant dense<0.000000e+00> : vector<8x8xf32>
    %5 = tpu.matmul %3, %4, %cst {dimension_numbers = #tpu.dot_dimension_numbers<[1], [1], [0], [0], [0, 0, 1, 0], [], []>} : vector<8x32xbf16>, vector<8x32xbf16>, vector<8x8xf32> -> vector<8x8xf32>
    %c0_4 = arith.constant 0 : index
    %c0_5 = arith.constant 0 : index
    %6 = vector.load %arg2[%c0_4, %c0_5] : memref<8x32xbf16, #tpu.memory_space<vmem>>, vector<8x32xbf16>
    %c0_6 = arith.constant 0 : index
    %c0_7 = arith.constant 0 : index
    %7 = vector.load %arg5[%c0_6, %c0_7] : memref<8x32xbf16, #tpu.memory_space<vmem>>, vector<8x32xbf16>
    %cst_8 = arith.constant dense<0.000000e+00> : vector<8x8xf32>
    %8 = tpu.matmul %6, %7, %cst_8 {dimension_numbers = #tpu.dot_dimension_numbers<[1], [1], [0], [0], [0, 0, 1, 0], [], []>} : vector<8x32xbf16>, vector<8x32xbf16>, vector<8x8xf32> -> vector<8x8xf32>
    %c0_9 = arith.constant 0 : index
    %c0_10 = arith.constant 0 : index
    %9 = vector.load %arg3[%c0_9, %c0_10] : memref<8x32xbf16, #tpu.memory_space<vmem>>, vector<8x32xbf16>
    %c0_11 = arith.constant 0 : index
    %c0_12 = arith.constant 0 : index
    %10 = vector.load %arg4[%c0_11, %c0_12] : memref<8x32xbf16, #tpu.memory_space<vmem>>, vector<8x32xbf16>
    %cst_13 = arith.constant dense<0.000000e+00> : vector<8x8xf32>
    %11 = tpu.matmul %9, %10, %cst_13 {dimension_numbers = #tpu.dot_dimension_numbers<[1], [1], [0], [0], [0, 0, 1, 0], [], []>} : vector<8x32xbf16>, vector<8x32xbf16>, vector<8x8xf32> -> vector<8x8xf32>
    %c0_14 = arith.constant 0 : index
    %c0_15 = arith.constant 0 : index
    %12 = vector.load %arg3[%c0_14, %c0_15] : memref<8x32xbf16, #tpu.memory_space<vmem>>, vector<8x32xbf16>
    %c0_16 = arith.constant 0 : index
    %c0_17 = arith.constant 0 : index
    %13 = vector.load %arg5[%c0_16, %c0_17] : memref<8x32xbf16, #tpu.memory_space<vmem>>, vector<8x32xbf16>
    %cst_18 = arith.constant dense<0.000000e+00> : vector<8x8xf32>
    %14 = tpu.matmul %12, %13, %cst_18 {dimension_numbers = #tpu.dot_dimension_numbers<[1], [1], [0], [0], [0, 0, 1, 0], [], []>} : vector<8x32xbf16>, vector<8x32xbf16>, vector<8x8xf32> -> vector<8x8xf32>
    %15 = tpu.iota {dimensions = array<i32: 0>} : vector<8x8xi32>
    %c8_i32 = arith.constant 8 : i32
    %16 = arith.muli %arg0, %c8_i32 : i32
    %c8_i32_19 = arith.constant 8 : i32
    %17 = arith.muli %arg1, %c8_i32_19 : i32
    %18 = arith.subi %16, %17 : i32
    %19 = vector.broadcast %18 : i32 to vector<8x8xi32>
    %20 = arith.addi %15, %19 : vector<8x8xi32>
    %21 = tpu.iota {dimensions = array<i32: 1>} : vector<8x8xi32>
    %22 = arith.cmpi eq, %20, %21 : vector<8x8xi32>
    %cst_20 = arith.constant 0xFF800000 : f32
    %23 = vector.broadcast %cst_20 : f32 to vector<8x8xf32>
    %24 = arith.select %22, %23, %5 : vector<8x8xi1>, vector<8x8xf32>
    %cst_21 = arith.constant 0xFF800000 : f32
    %25 = vector.broadcast %cst_21 : f32 to vector<8x8xf32>
    %26 = arith.select %22, %25, %14 : vector<8x8xi1>, vector<8x8xf32>
    %c0_22 = arith.constant 0 : index
    %c0_23 = arith.constant 0 : index
    %27 = vector.load %arg7[%c0_22, %c0_23] : memref<8x1xf32, #tpu.memory_space<vmem>>, vector<8x1xf32>
    %c0_24 = arith.constant 0 : index
    %c0_25 = arith.constant 0 : index
    %28 = vector.load %arg9[%c0_24, %c0_25] : memref<8x1xf32, #tpu.memory_space<vmem>>, vector<8x1xf32>
    %29 = arith.maximumf %24, %8 : vector<8x8xf32>
    %cst_26 = arith.constant dense<0xFF800000> : vector<8xf32>
    %30 = vector.multi_reduction <maximumf>, %29, %cst_26 [1] : vector<8x8xf32> to vector<8xf32>
    %31 = vector.shape_cast %30 : vector<8xf32> to vector<8x1xf32>
    %32 = arith.maximumf %27, %31 : vector<8x1xf32>
    %33 = arith.maximumf %11, %26 : vector<8x8xf32>
    %cst_27 = arith.constant dense<0xFF800000> : vector<8xf32>
    %34 = vector.multi_reduction <maximumf>, %33, %cst_27 [1] : vector<8x8xf32> to vector<8xf32>
    %35 = vector.shape_cast %34 : vector<8xf32> to vector<8x1xf32>
    %36 = arith.maximumf %28, %35 : vector<8x1xf32>
    %37 = vector.broadcast %32 : vector<8x1xf32> to vector<8x8xf32>
    %38 = arith.subf %24, %37 : vector<8x8xf32>
    %cst_28 = arith.constant 1.000000e+01 : f32
    %39 = vector.broadcast %cst_28 : f32 to vector<8x8xf32>
    %40 = arith.mulf %38, %39 : vector<8x8xf32>
    %41 = math.exp %40 : vector<8x8xf32>
    %42 = vector.broadcast %32 : vector<8x1xf32> to vector<8x8xf32>
    %43 = arith.subf %8, %42 : vector<8x8xf32>
    %cst_29 = arith.constant 1.000000e+01 : f32
    %44 = vector.broadcast %cst_29 : f32 to vector<8x8xf32>
    %45 = arith.mulf %43, %44 : vector<8x8xf32>
    %46 = math.exp %45 : vector<8x8xf32>
    %47 = arith.addf %41, %46 : vector<8x8xf32>
    %48 = vector.broadcast %36 : vector<8x1xf32> to vector<8x8xf32>
    %49 = arith.subf %26, %48 : vector<8x8xf32>
    %cst_30 = arith.constant 1.000000e+01 : f32
    %50 = vector.broadcast %cst_30 : f32 to vector<8x8xf32>
    %51 = arith.mulf %49, %50 : vector<8x8xf32>
    %52 = math.exp %51 : vector<8x8xf32>
    %53 = vector.broadcast %36 : vector<8x1xf32> to vector<8x8xf32>
    %54 = arith.subf %11, %53 : vector<8x8xf32>
    %cst_31 = arith.constant 1.000000e+01 : f32
    %55 = vector.broadcast %cst_31 : f32 to vector<8x8xf32>
    %56 = arith.mulf %54, %55 : vector<8x8xf32>
    %57 = math.exp %56 : vector<8x8xf32>
    %58 = arith.addf %52, %57 : vector<8x8xf32>
    %59 = arith.subf %27, %32 : vector<8x1xf32>
    %cst_32 = arith.constant 1.000000e+01 : f32
    %60 = vector.broadcast %cst_32 : f32 to vector<8x1xf32>
    %61 = arith.mulf %59, %60 : vector<8x1xf32>
    %62 = math.exp %61 : vector<8x1xf32>
    %c0_33 = arith.constant 0 : index
    %c0_34 = arith.constant 0 : index
    %63 = vector.load %arg8[%c0_33, %c0_34] : memref<8x1xf32, #tpu.memory_space<vmem>>, vector<8x1xf32>
    %64 = arith.mulf %62, %63 : vector<8x1xf32>
    %cst_35 = arith.constant dense<0.000000e+00> : vector<8xf32>
    %65 = vector.multi_reduction <add>, %47, %cst_35 [1] : vector<8x8xf32> to vector<8xf32>
    %66 = vector.shape_cast %65 : vector<8xf32> to vector<8x1xf32>
    %67 = arith.addf %64, %66 : vector<8x1xf32>
    %c0_36 = arith.constant 0 : index
    %c0_37 = arith.constant 0 : index
    %68 = vector.load %arg8[%c0_36, %c0_37] : memref<8x1xf32, #tpu.memory_space<vmem>>, vector<8x1xf32>
    tpu.vector_store %arg8[%c0_36, %c0_37], %67 {strides = array<i32>} : memref<8x1xf32, #tpu.memory_space<vmem>>, vector<8x1xf32>,
    %69 = arith.subf %28, %36 : vector<8x1xf32>
    %cst_38 = arith.constant 1.000000e+01 : f32
    %70 = vector.broadcast %cst_38 : f32 to vector<8x1xf32>
    %71 = arith.mulf %69, %70 : vector<8x1xf32>
    %72 = math.exp %71 : vector<8x1xf32>
    %c0_39 = arith.constant 0 : index
    %c0_40 = arith.constant 0 : index
    %73 = vector.load %arg10[%c0_39, %c0_40] : memref<8x1xf32, #tpu.memory_space<vmem>>, vector<8x1xf32>
    %74 = arith.mulf %72, %73 : vector<8x1xf32>
    %cst_41 = arith.constant dense<0.000000e+00> : vector<8xf32>
    %75 = vector.multi_reduction <add>, %58, %cst_41 [1] : vector<8x8xf32> to vector<8xf32>
    %76 = vector.shape_cast %75 : vector<8xf32> to vector<8x1xf32>
    %77 = arith.addf %74, %76 : vector<8x1xf32>
    %c0_42 = arith.constant 0 : index
    %c0_43 = arith.constant 0 : index
    %78 = vector.load %arg10[%c0_42, %c0_43] : memref<8x1xf32, #tpu.memory_space<vmem>>, vector<8x1xf32>
    tpu.vector_store %arg10[%c0_42, %c0_43], %77 {strides = array<i32>} : memref<8x1xf32, #tpu.memory_space<vmem>>, vector<8x1xf32>,
    %c0_44 = arith.constant 0 : index
    %c0_45 = arith.constant 0 : index
    %79 = vector.load %arg7[%c0_44, %c0_45] : memref<8x1xf32, #tpu.memory_space<vmem>>, vector<8x1xf32>
    tpu.vector_store %arg7[%c0_44, %c0_45], %32 {strides = array<i32>} : memref<8x1xf32, #tpu.memory_space<vmem>>, vector<8x1xf32>,
    %c0_46 = arith.constant 0 : index
    %c0_47 = arith.constant 0 : index
    %80 = vector.load %arg9[%c0_46, %c0_47] : memref<8x1xf32, #tpu.memory_space<vmem>>, vector<8x1xf32>
    tpu.vector_store %arg9[%c0_46, %c0_47], %36 {strides = array<i32>} : memref<8x1xf32, #tpu.memory_space<vmem>>, vector<8x1xf32>,
    %c0_i32_48 = arith.constant 0 : i32
    %81 = arith.cmpi eq, %arg1, %c0_i32_48 : i32
    %82 = arith.extui %81 : i1 to i32
    %c0_i32_49 = arith.constant 0 : i32
    %83 = arith.cmpi ne, %82, %c0_i32_49 : i32
    scf.if %83 {
      %c0_50 = arith.constant 0 : index
      %c0_51 = arith.constant 0 : index
      %84 = vector.load %arg2[%c0_50, %c0_51] : memref<8x32xbf16, #tpu.memory_space<vmem>>, vector<8x32xbf16>
      %85 = arith.extf %84 : vector<8x32xbf16> to vector<8x32xf32>
      %c0_52 = arith.constant 0 : index
      %c0_53 = arith.constant 0 : index
      %86 = vector.load %arg3[%c0_52, %c0_53] : memref<8x32xbf16, #tpu.memory_space<vmem>>, vector<8x32xbf16>
      %87 = arith.extf %86 : vector<8x32xbf16> to vector<8x32xf32>
      %88 = arith.mulf %85, %87 : vector<8x32xf32>
      %cst_54 = arith.constant dense<0.000000e+00> : vector<8xf32>
      %89 = vector.multi_reduction <add>, %88, %cst_54 [1] : vector<8x32xf32> to vector<8xf32>
      %90 = vector.shape_cast %89 : vector<8xf32> to vector<8x1xf32>
      %cst_55 = arith.constant 1.000000e+01 : f32
      %91 = vector.broadcast %cst_55 : f32 to vector<8x1xf32>
      %92 = arith.mulf %90, %91 : vector<8x1xf32>
      %c0_56 = arith.constant 0 : index
      %c0_57 = arith.constant 0 : index
      %93 = vector.load %arg7[%c0_56, %c0_57] : memref<8x1xf32, #tpu.memory_space<vmem>>, vector<8x1xf32>
      %cst_58 = arith.constant 1.000000e+01 : f32
      %94 = vector.broadcast %cst_58 : f32 to vector<8x1xf32>
      %95 = arith.mulf %93, %94 : vector<8x1xf32>
      %c0_59 = arith.constant 0 : index
      %c0_60 = arith.constant 0 : index
      %96 = vector.load %arg8[%c0_59, %c0_60] : memref<8x1xf32, #tpu.memory_space<vmem>>, vector<8x1xf32>
      %97 = math.log %96 : vector<8x1xf32>
      %98 = arith.addf %95, %97 : vector<8x1xf32>
      %99 = arith.subf %98, %92 : vector<8x1xf32>
      %c0_61 = arith.constant 0 : index
      %c0_62 = arith.constant 0 : index
      %100 = vector.load %arg9[%c0_61, %c0_62] : memref<8x1xf32, #tpu.memory_space<vmem>>, vector<8x1xf32>
      %cst_63 = arith.constant 1.000000e+01 : f32
      %101 = vector.broadcast %cst_63 : f32 to vector<8x1xf32>
      %102 = arith.mulf %100, %101 : vector<8x1xf32>
      %c0_64 = arith.constant 0 : index
      %c0_65 = arith.constant 0 : index
      %103 = vector.load %arg10[%c0_64, %c0_65] : memref<8x1xf32, #tpu.memory_space<vmem>>, vector<8x1xf32>
      %104 = math.log %103 : vector<8x1xf32>
      %105 = arith.addf %102, %104 : vector<8x1xf32>
      %106 = arith.subf %105, %92 : vector<8x1xf32>
      %c0_66 = arith.constant 0 : index
      %c0_67 = arith.constant 0 : index
      %c0_68 = arith.constant 0 : index
      %107 = vector.load %arg6[%c0_66, %c0_67, %c0_68] : memref<2x8x1xf32, #tpu.memory_space<vmem>>, vector<1x8x1xf32>
      %108 = vector.shape_cast %107 : vector<1x8x1xf32> to vector<8x1xf32>
      %109 = vector.shape_cast %99 : vector<8x1xf32> to vector<1x8x1xf32>
      tpu.vector_store %arg6[%c0_66, %c0_67, %c0_68], %109 {strides = array<i32>} : memref<2x8x1xf32, #tpu.memory_space<vmem>>, vector<1x8x1xf32>,
      %c1 = arith.constant 1 : index
      %c0_69 = arith.constant 0 : index
      %c0_70 = arith.constant 0 : index
      %110 = vector.load %arg6[%c1, %c0_69, %c0_70] : memref<2x8x1xf32, #tpu.memory_space<vmem>>, vector<1x8x1xf32>
      %111 = vector.shape_cast %110 : vector<1x8x1xf32> to vector<8x1xf32>
      %112 = vector.shape_cast %106 : vector<8x1xf32> to vector<1x8x1xf32>
      tpu.vector_store %arg6[%c1, %c0_69, %c0_70], %112 {strides = array<i32>} : memref<2x8x1xf32, #tpu.memory_space<vmem>>, vector<1x8x1xf32>,
    } else {
    }
    return
  }
  func.func @transform_0(%arg0: i32, %arg1: i32) -> (i32, i32) {
    %c0_i32 = arith.constant 0 : i32
    %c0_i32_0 = arith.constant 0 : i32
    return %arg0, %c0_i32 : i32, i32
  }
  func.func @transform_1(%arg0: i32, %arg1: i32) -> (i32, i32) {
    %c0_i32 = arith.constant 0 : i32
    %c0_i32_0 = arith.constant 0 : i32
    return %arg0, %c0_i32 : i32, i32
  }
  func.func @transform_2(%arg0: i32, %arg1: i32) -> (i32, i32) {
    %c0_i32 = arith.constant 0 : i32
    %c0_i32_0 = arith.constant 0 : i32
    return %arg1, %c0_i32 : i32, i32
  }
  func.func @transform_3(%arg0: i32, %arg1: i32) -> (i32, i32) {
    %c0_i32 = arith.constant 0 : i32
    %c0_i32_0 = arith.constant 0 : i32
    return %arg1, %c0_i32 : i32, i32
  }
  func.func @transform_4(%arg0: i32, %arg1: i32) -> (i32, i32, i32) {
    %c0_i32 = arith.constant 0 : i32
    %c0_i32_0 = arith.constant 0 : i32
    %c0_i32_1 = arith.constant 0 : i32
    return %c0_i32, %arg0, %c0_i32_0 : i32, i32, i32
  }
}

</mosaic_0001>

<bundles_post_ra>
// kernel: tpu_custom_call.1
= control target key start
LH: loop header
LB: loop body
LE: loop exit
PB: predicated region body
PF: predicated region fallthrough
CT: control target
= control target key end

     0   :  { %9 = vsyncpa [#allocation7], 0  ;;  %s544_s0 = inlined_call_operand.hbm [shape: bf16[8,32], index: 0, kind: input, shape index: {}]   ;;  %s545_s1 = inlined_call_operand.hbm [shape: bf16[8,32], index: 1, kind: input, shape index: {}]   ;;  %s546_s2 = inlined_call_operand.vmem [shape: bf16[8,32], index: 2, kind: input, shape index: {}]   ;;  %s547_s3 = inlined_call_operand.vmem [shape: bf16[8,32], index: 3, kind: input, shape index: {}]   ;;  %s548_s4 = inlined_call_operand.vmem [shape: f32[2,8,1], index: 4, kind: output, shape index: {}]  }
   0x1   :  { %10 = vsyncpa [#allocation9], 0  ;;  %s450_s15 = smov [#allocation6]   ;;  %s451_s17 = smov [#allocation8]  }
   0x2   :  { %s17_s16 = sshll.u32 %s450_s15, 4  ;;  %s27_s18 = sshll.u32 %s451_s17, 4  ;;  %s18_s16 = int_to_ptr.vmem [resolvable:$true] %s17_s16  ;;  %s28_s18 = int_to_ptr.vmem [resolvable:$true] %s27_s18 }
   0x3   :  { %s402_s21 = scalar_lea.hbm %s544_s0, 64 }
   0x4   :  { %p403_p0 = scmp.ne.s32.totalorder %s544_s0, %s402_s21  ;;  %p406_p1 = scmp.lt.u32.totalorder %s402_s21, %s544_s0 }
   0x6   :  { %p408_p2 = pnand %p406_p1, %p403_p0 }
   0x8   :  { %411 = shalt.err (!%p408_p2)
}
   0x9   :  { %s412_s26 = scalar_lea.vmem %s18_s16, 64  ;;  %p417_p4 = scmp.lt.s32.totalorder %s18_s16, %s18_s16 }
   0xa   :  { %p413_p3 = scmp.ne.s32.totalorder %s18_s16, %s412_s26  ;;  %p418_p5 = scmp.lt.s32.totalorder %s412_s26, %s412_s26 }
   0xc   :  { %p419_p6 = por %p418_p5, %p417_p4 }
   0xe   :  { %p420_p7 = pnand %p419_p6, %p413_p3 }
  0x10   :  { %423 = shalt.err (!%p420_p7)
}
  0x11   :  { %20 = dma.hbm_to_vmem [thread:$0]  %s544_s0, 64, %s18_s16, [#allocation7]  }
  0x12   :  { %s424_s5 = scalar_lea.hbm %s545_s1, 64 }
  0x13   :  { %p425_p8 = scmp.ne.s32.totalorder %s545_s1, %s424_s5  ;;  %p428_p9 = scmp.lt.u32.totalorder %s424_s5, %s545_s1 }
  0x15   :  { %p430_p10 = pnand %p428_p9, %p425_p8 }
  0x17   :  { %433 = shalt.err (!%p430_p10)
}
  0x18   :  { %s434_s10 = scalar_lea.vmem %s28_s18, 64  ;;  %p439_p12 = scmp.lt.s32.totalorder %s28_s18, %s28_s18 }
  0x19   :  { %p435_p11 = scmp.ne.s32.totalorder %s28_s18, %s434_s10  ;;  %p440_p13 = scmp.lt.s32.totalorder %s434_s10, %s434_s10 }
  0x1b   :  { %p441_p0 = por %p440_p13, %p439_p12 }
  0x1d   :  { %p442_p1 = pnand %p441_p0, %p435_p11 }
  0x1f   :  { %445 = shalt.err (!%p442_p1)
}
  0x20   :  { %30 = dma.hbm_to_vmem [thread:$0]  %s545_s1, 64, %s28_s18, [#allocation9]  }
  0x21   :  { %446 = dma.done.wait [#allocation7], 64  }
  0x22   :  { %447 = vsyncadd [#allocation7], 4294967232 }
  0x23   :  { %448 = dma.done.wait [#allocation9], 64  }
  0x24   :  { %449 = vsyncadd [#allocation9], 4294967232  ;;  %v452_v0 = vmov 0.0   ;;  %vm453_vm0 = vmmov 0   ;;  %vm53_vm1 = vcmask 261120   ;;  %vm46_vm2 = vcmask 7168  }
  0x25   :  { %354 = vmatprep.subr.bf16.mxu0 %v452_v0  ;;  %360 = vmatprep.subr.bf16.mxu1 %v452_v0  ;;  %v52_v1 = vld [vmem:[%s546_s2] sm:$0xf]  ;;  %v51_v5 = vld [vmem:[#allocation6] sm:$0xf]  ;;  %v144_v6 = vld [vmem:[#allocation8] sm:$0xf]  ;;  %v228_v8 = vlaneseq }
  0x26   :  { %356 = vmatprep.mubr.msk.bf16.mxu0 %vm453_vm0, %v452_v0  ;;  %362 = vmatprep.mubr.msk.bf16.mxu1 %vm453_vm0, %v452_v0  ;;  %v100_v2 = vld [vmem:[%s547_s3] sm:$0xf]  ;;  %v58_v3 = vsel %vm53_vm1, %v52_v1, 0  ;;  %v454_v7 = vmov -inf   ;;  %49 = vst.msk [vmem:[#allocation3] sm:$0xff] %vm46_vm2, %v452_v0  ;;  %50 = vst.msk [vmem:[#allocation5] sm:$0xff] %vm46_vm2, %v452_v0 }
  0x27   :  { %v102_v4 = vsel %vm53_vm1, %v100_v2, 0  ;;  %355 = vmatpush3.bf16.xpose.msra.mxu0 %v58_v3  ;;  %47 = vst.msk [vmem:[#allocation2] sm:$0xff] %vm46_vm2, %v454_v7  ;;  %48 = vst.msk [vmem:[#allocation4] sm:$0xff] %vm46_vm2, %v454_v7  ;;  %v229_v9 = vshrl.u32 %v228_v8, 7  ;;  %v236_v10 = vand.u32 127, %v228_v8  ;;  %vm243_vm4 = vcmask 64512  }
  0x28   :  { %361 = vmatpush3.bf16.xpose.msra.mxu1 %v102_v4  ;;  %366 = vmatprep.subr.bf16.mxu0 %v452_v0  ;;  %v455_v33 = vmov 0   ;;  %v309_v54 = vld [vmem:[#allocation6] sm:$0xf]  ;;  %v311_v55 = vld [vmem:[#allocation8] sm:$0xf] }
  0x29   :  { %372 = vmatprep.subr.bf16.mxu1 %v452_v0  ;;  %vm237_vm3 = vcmp.eq.s32.totalorder %v229_v9, %v236_v10  ;;  %384 = vset.pattern.permute.xlu1 %v455_v33  ;;  %v310_v58 = vunpack.c.l.bf16 %v309_v54  ;;  %v312_v59 = vunpack.c.l.bf16 %v311_v55 }
  0x2a   :  { %385 = vset.pattern.permute.xlu0 %v455_v33 }
  0x2b   :  { %v313_v63 = vmul.f32 %v312_v59, %v310_v58 }
  0x2d   :  { %v314_v1 = vsel %vm53_vm1, %v313_v63, 0.0 }
  0x2e   :  { %357 = vmatmul.mubr.msk.bf16.vlgmr.msra.gmra.mrb[0].mxu0 %vm53_vm1, %v51_v5  ;;  %v240_v34 = vld [vmem:[#allocation2] sm:$0xff]  ;;  %v241_v38 = vld [vmem:[#allocation4] sm:$0xff] }
  0x2f   :  { %363 = vmatmul.mubr.msk.bf16.vlgmr.msra.gmra.mrb[0].mxu1 %vm53_vm1, %v51_v5  ;;  %367 = vmatpush3.bf16.xpose.msra.mxu0 %v58_v3 }
  0x30   :  { %373 = vmatpush3.bf16.xpose.msra.mxu1 %v102_v4  ;;  %368 = vmatprep.mubr.msk.bf16.mxu0 %vm453_vm0, %v452_v0 }
  0x31   :  { %374 = vmatprep.mubr.msk.bf16.mxu1 %vm453_vm0, %v452_v0 }
  0x36   :  { %369 = vmatmul.mubr.msk.bf16.vlgmr.msra.gmra.mrb[4].mxu0 %vm53_vm1, %v144_v6 }
  0x37   :  { %375 = vmatmul.mubr.msk.bf16.vlgmr.msra.gmra.mrb[4].mxu1 %vm53_vm1, %v144_v6 }
 0x101   :  { %v94_v11 = vpop.f32.mrb[0].mxu0 }
 0x102   :  { %v138_v12 = vpop.f32.mrb[0].mxu1  ;;  %v238_v13 = vsel %vm237_vm3, -inf, %v94_v11  ;;  %v358_v14 = vpop.f32.mrb[1].mxu0  ;;  %v285_v11 = vld [vmem:[#allocation3] sm:$0xff] }
 0x103   :  { %v364_v15 = vpop.f32.mrb[1].mxu1  ;;  %v97_v16 = vpop.f32.mrb[2].mxu0  ;;  %v242_v18 = vmax.f32 %v238_v13, %v138_v12 }
 0x104   :  { %v141_v17 = vpop.f32.mrb[2].mxu1  ;;  %v359_v19 = vpop.f32.mrb[3].mxu0  ;;  %v297_v16 = vld [vmem:[#allocation5] sm:$0xff] }
 0x105   :  { %v365_v20 = vpop.f32.mrb[3].mxu1  ;;  %v244_v21 = vsel %vm243_vm4, %v242_v18, -inf }
 0x106   :  { %245 = vmax.xlane.f32.xlu0 %v244_v21 }
 0x109   :  { %v182_v22 = vpop.f32.mrb[4].mxu0 }
 0x10a   :  { %v222_v23 = vpop.f32.mrb[4].mxu1  ;;  %v370_v25 = vpop.f32.mrb[5].mxu0 }
 0x10b   :  { %v239_v24 = vsel %vm237_vm3, -inf, %v222_v23  ;;  %v376_v26 = vpop.f32.mrb[5].mxu1  ;;  %v185_v28 = vpop.f32.mrb[6].mxu0 }
 0x10c   :  { %v248_v27 = vmax.f32 %v182_v22, %v239_v24  ;;  %v225_v29 = vpop.f32.mrb[6].mxu1  ;;  %v371_v30 = vpop.f32.mrb[7].mxu0 }
 0x10d   :  { %v377_v31 = vpop.f32.mrb[7].mxu1 }
 0x10e   :  { %v249_v32 = vsel %vm243_vm4, %v248_v27, -inf }
 0x10f   :  { %250 = vmax.xlane.f32.xlu0 %v249_v32 }
 0x193   :  { %v246_v35 = vpop.xlane.xlu0 %245 }
 0x194   :  { %v247_v36 = vmax.f32 %v240_v34, %v246_v35 }
 0x196   :  { %v281_v37 = vsub.f32 %v240_v34, %v247_v36  ;;  %304 = vst.msk [vmem:[#allocation2] sm:$0xff] %vm46_vm2, %v247_v36  ;;  %255 = vperm.xlu1 %384, %v247_v36  }
 0x198   :  { %v282_v6 = vmul.f32 10.0, %v281_v37 }
 0x19a   :  { %v283_v7 = vmul.f32 1.442695, %v282_v6 }
 0x19c   :  { %v251_v39 = vpop.xlane.xlu0 %250 }
 0x19d   :  { %v252_v40 = vmax.f32 %v241_v38, %v251_v39  ;;  %v318_v23 = vld [vmem:[#allocation2] sm:$0xff] }
 0x19e   :  { %v319_v26 = vmul.f32 10.0, %v318_v23 }
 0x19f   :  { %v293_v41 = vsub.f32 %v241_v38, %v252_v40  ;;  %305 = vst.msk [vmem:[#allocation4] sm:$0xff] %vm46_vm2, %v252_v40  ;;  %269 = vperm.xlu1 %384, %v252_v40  }
 0x1a1   :  { %v294_v8 = vmul.f32 10.0, %v293_v41 }
 0x1a3   :  { %v295_v9 = vmul.f32 1.442695, %v294_v8 }
 0x1a6   :  { %v325_v30 = vld [vmem:[#allocation4] sm:$0xff] }
 0x1a7   :  { %v326_v32 = vmul.f32 10.0, %v325_v30 }
 0x215   :  { %v256_v42 = vpop.permute.xlu1 %255 }
 0x216   :  { %v258_v43 = vsub.f32 %v238_v13, %v256_v42  ;;  %v262_v44 = vsub.f32 %v138_v12, %v256_v42 }
 0x218   :  { %v259_v45 = vmul.f32 10.0, %v258_v43  ;;  %v263_v46 = vmul.f32 10.0, %v262_v44 }
 0x21a   :  { %v260_v47 = vmul.f32 1.442695, %v259_v45  ;;  %v264_v48 = vmul.f32 1.442695, %v263_v46 }
 0x21c   :  { %386 = vpow2.f32 %v260_v47 }
 0x21d   :  { %388 = vpow2.f32 %v264_v48 }
 0x21e   :  { %v270_v49 = vpop.permute.xlu1 %269 }
 0x21f   :  { %v272_v50 = vsub.f32 %v239_v24, %v270_v49  ;;  %v276_v51 = vsub.f32 %v182_v22, %v270_v49 }
 0x221   :  { %v273_v52 = vmul.f32 10.0, %v272_v50  ;;  %v277_v53 = vmul.f32 10.0, %v276_v51 }
 0x223   :  { %v274_v56 = vmul.f32 1.442695, %v273_v52  ;;  %v278_v57 = vmul.f32 1.442695, %v277_v53 }
 0x225   :  { %390 = vpow2.f32 %v274_v56 }
 0x226   :  { %392 = vpow2.f32 %v278_v57  ;;  %v387_v60 = vpop.eup %386 }
 0x227   :  { %v389_v61 = vpop.eup %388  ;;  %394 = vpow2.f32 %v283_v7 }
 0x228   :  { %v266_v62 = vadd.f32 %v389_v61, %v387_v60  ;;  %396 = vpow2.f32 %v295_v9 }
 0x22a   :  { %v287_v0 = vsel %vm243_vm4, %v266_v62, 0.0 }
 0x22b   :  { %288 = vadd.xlane.f32.xlu0 %v287_v0 }
 0x22f   :  { %v391_v2 = vpop.eup %390  ;;  %315 = vadd.xlane.f32.xlu0 %v314_v1 }
 0x230   :  { %v393_v3 = vpop.eup %392 }
 0x231   :  { %v280_v4 = vadd.f32 %v393_v3, %v391_v2  ;;  %v395_v10 = vpop.eup %394 }
 0x232   :  { %v286_v12 = vmul.f32 %v395_v10, %v285_v11  ;;  %v397_v15 = vpop.eup %396 }
 0x233   :  { %v299_v5 = vsel %vm243_vm4, %v280_v4, 0.0  ;;  %v298_v17 = vmul.f32 %v397_v15, %v297_v16 }
 0x234   :  { %300 = vadd.xlane.f32.xlu1 %v299_v5 }
 0x2b8   :  { %v289_v13 = vpop.xlane.xlu0 %288 }
 0x2b9   :  { %v290_v14 = vadd.f32 %v289_v13, %v286_v12 }
 0x2bb   :  { %292 = vst.msk [vmem:[#allocation3] sm:$0xff] %vm46_vm2, %v290_v14 }
 0x2bc   :  { %v316_v22 = vpop.xlane.xlu0 %315 }
 0x2bd   :  { %v317_v25 = vmul.f32 10.0, %v316_v22 }
 0x2c1   :  { %v301_v18 = vpop.xlane.xlu1 %300 }
 0x2c2   :  { %v302_v19 = vadd.f32 %v301_v18, %v298_v17  ;;  %v320_v20 = vld [vmem:[#allocation3] sm:$0xff] }
 0x2c3   :  { %398 = vlog2.f32 %v320_v20 }
 0x2c4   :  { %303 = vst.msk [vmem:[#allocation5] sm:$0xff] %vm46_vm2, %v302_v19 }
 0x2cb   :  { %v327_v21 = vld [vmem:[#allocation5] sm:$0xff] }
 0x2cc   :  { %400 = vlog2.f32 %v327_v21 }
 0x2cd   :  { %v399_v24 = vpop.eup %398 }
 0x2ce   :  { %v322_v27 = vmul.f32 0.6931472, %v399_v24 }
 0x2d0   :  { %v323_v28 = vadd.f32 %v322_v27, %v319_v26 }
 0x2d2   :  { %v324_v29 = vsub.f32 %v323_v28, %v317_v25 }
 0x2d4   :  { %332 = vst.msk [vmem:[%s548_s4] sm:$0xff] %vm46_vm2, %v324_v29 }
 0x2d6   :  { %v401_v31 = vpop.eup %400 }
 0x2d7   :  { %v329_v33 = vmul.f32 0.6931472, %v401_v31 }
 0x2d9   :  { %v330_v34 = vadd.f32 %v329_v33, %v326_v32 }
 0x2db   :  { %v331_v35 = vsub.f32 %v330_v34, %v317_v25 }
 0x2dd   :  { %345 = vst.msk [vmem:[%s548_s4 + $0x8] sm:$0xff] %vm46_vm2, %v331_v35 }
 0x2de   :  { %339 = vsyncpa [#allocation7], 1 }
 0x2df   :  { %340 = vsyncpa [#allocation9], 1 }

</bundles_post_ra>
